<compile_context>
chip_gen: v7x
topology: tpu7x:2x2x1
jax: 0.10.0
libtpu: 0.0.40
codegen_flags: <defaults>
</compile_context>

<pallas_src>
import functools

import jax
import jax.numpy as jnp
from jax.experimental import pallas as pl
from jax.experimental.pallas import tpu as pltpu

LANE = 128
_VMEM_LIMIT = 48 * 1024 * 1024          # within v7x's 64 MiB physical VMEM
_RESIDENT_B_BYTES = 12 * 1024 * 1024    # budget for the double-buffered resident B


def _round_up(v, m):
    return ((v + m - 1) // m) * m


def _pad2d(x, rows, cols):
    r, c = x.shape
    return jnp.pad(x, ((0, rows - r), (0, cols - c)))


def _pick_row_tile(m):
    """Largest row tile giving >=2 (ideally an even number of) row tiles
    so the 'parallel' axis splits across v7x's two TensorCores."""
    cands = (1024, 512, 256, 128)
    for want_even in (True, False):
        for t in cands:
            if m % t == 0:
                n_tiles = m // t
                if n_tiles >= 2 and (not want_even or n_tiles % 2 == 0):
                    return t
    for t in cands:
        if m % t == 0:
            return t
    return m


def _pick_k_tile(k):
    for t in (2048, 1024, 512, 256, 128):
        if k % t == 0:
            return t
    return k


# ---------------------------------------------------------------------------
# Thin feature GEMM:  out = A @ B   (no bias -- hoisted out of the A_hat stream)
# ---------------------------------------------------------------------------
def _thin_matmul_kernel(a_ref, b_ref, o_ref, acc_ref):
    k = pl.program_id(1)

    @pl.when(k == 0)
    def _():
        acc_ref[...] = jnp.zeros_like(acc_ref)

    acc_ref[...] += jnp.dot(a_ref[...], b_ref[...],
                            preferred_element_type=jnp.float32)

    @pl.when(k == pl.num_programs(1) - 1)
    def _():
        o_ref[...] = acc_ref[...].astype(o_ref.dtype)


def thin_matmul(a, b, *, out_dtype):
    m, kdim = a.shape
    _, c = b.shape
    tm = _pick_row_tile(m)
    tk = _pick_k_tile(kdim)
    return pl.pallas_call(
        _thin_matmul_kernel,
        out_shape=jax.ShapeDtypeStruct((m, c), out_dtype),
        grid_spec=pltpu.PrefetchScalarGridSpec(
            num_scalar_prefetch=0,
            grid=(m // tm, kdim // tk),
            in_specs=[
                pl.BlockSpec((tm, tk), lambda i, k: (i, k)),
                pl.BlockSpec((tk, c), lambda i, k: (k, 0)),
            ],
            out_specs=pl.BlockSpec((tm, c), lambda i, k: (i, 0)),
            scratch_shapes=[pltpu.VMEM((tm, c), jnp.float32)],
        ),
        compiler_params=pltpu.CompilerParams(
            dimension_semantics=("parallel", "arbitrary"),
            vmem_limit_bytes=_VMEM_LIMIT,
        ),
    )(a, b)


# ---------------------------------------------------------------------------
# A-streaming pass 1:  HW3 = relu(A_hat @ XW + b1) @ W3   (W3 fused epilogue)
# ---------------------------------------------------------------------------
def _a_pass1_kernel(a_ref, b_ref, b1_ref, w3_ref, o_ref, acc_ref, *, tk, b_resident):
    k = pl.program_id(1)

    @pl.when(k == 0)
    def _():
        acc_ref[...] = jnp.zeros_like(acc_ref)

    if b_resident:
        b_tile = b_ref[pl.ds(pl.multiple_of(k * tk, tk), tk), :]
    else:
        b_tile = b_ref[...]
    acc_ref[...] += jnp.dot(a_ref[...], b_tile, preferred_element_type=jnp.float32)

    @pl.when(k == pl.num_programs(1) - 1)
    def _():
        h = jnp.maximum(acc_ref[...] + b1_ref[...], 0.0)
        # F.dropout(p=0.5, training=False) == identity in eval mode.
        # TODO(synk): training-mode dropout (pltpu.prng_random_bits mask) not emitted.
        o_ref[...] = jnp.dot(h.astype(w3_ref.dtype), w3_ref[...],
                             preferred_element_type=jnp.float32).astype(o_ref.dtype)


def a_stream_pass1(a, xw, b1, w3, *, out_dtype=jnp.bfloat16):
    n_p = a.shape[0]
    hid = xw.shape[1]
    cls = w3.shape[1]
    tm = _pick_row_tile(n_p)
    tk = _pick_k_tile(n_p)
    b_resident = 2 * n_p * hid * xw.dtype.itemsize <= _RESIDENT_B_BYTES
    if b_resident:
        b_spec = pl.BlockSpec((n_p, hid), lambda i, k: (0, 0))   # fetched once
    else:
        b_spec = pl.BlockSpec((tk, hid), lambda i, k: (k, 0))    # streaming fallback
    kernel = functools.partial(_a_pass1_kernel, tk=tk, b_resident=b_resident)
    return pl.pallas_call(
        kernel,
        out_shape=jax.ShapeDtypeStruct((n_p, cls), out_dtype),
        grid_spec=pltpu.PrefetchScalarGridSpec(
            num_scalar_prefetch=0,
            grid=(n_p // tm, n_p // tk),
            in_specs=[
                pl.BlockSpec((tm, tk), lambda i, k: (i, k)),     # A_hat stream
                b_spec,                                          # XW (resident)
                pl.BlockSpec((1, hid), lambda i, k: (0, 0)),     # b1
                pl.BlockSpec((hid, cls), lambda i, k: (0, 0)),   # W3 (resident)
            ],
            out_specs=pl.BlockSpec((tm, cls), lambda i, k: (i, 0)),
            scratch_shapes=[pltpu.VMEM((tm, hid), jnp.float32)],
        ),
        compiler_params=pltpu.CompilerParams(
            dimension_semantics=("parallel", "arbitrary"),
            vmem_limit_bytes=_VMEM_LIMIT,
        ),
    )(a, xw, b1, w3)


# ---------------------------------------------------------------------------
# A-streaming pass 2:  OUT = A_hat @ HW3 + b3
# ---------------------------------------------------------------------------
def _a_pass2_kernel(a_ref, b_ref, b3_ref, o_ref, acc_ref, *, tk, b_resident):
    k = pl.program_id(1)

    @pl.when(k == 0)
    def _():
        acc_ref[...] = jnp.zeros_like(acc_ref)

    if b_resident:
        b_tile = b_ref[pl.ds(pl.multiple_of(k * tk, tk), tk), :]
    else:
        b_tile = b_ref[...]
    acc_ref[...] += jnp.dot(a_ref[...], b_tile, preferred_element_type=jnp.float32)

    @pl.when(k == pl.num_programs(1) - 1)
    def _():
        o_ref[...] = (acc_ref[...] + b3_ref[...]).astype(o_ref.dtype)


def a_stream_pass2(a, hw3, b3, *, out_dtype=jnp.float32):
    n_p = a.shape[0]
    cls = hw3.shape[1]
    tm = _pick_row_tile(n_p)
    tk = _pick_k_tile(n_p)
    b_resident = 2 * n_p * cls * hw3.dtype.itemsize <= _RESIDENT_B_BYTES
    if b_resident:
        b_spec = pl.BlockSpec((n_p, cls), lambda i, k: (0, 0))
    else:
        b_spec = pl.BlockSpec((tk, cls), lambda i, k: (k, 0))
    kernel = functools.partial(_a_pass2_kernel, tk=tk, b_resident=b_resident)
    return pl.pallas_call(
        kernel,
        out_shape=jax.ShapeDtypeStruct((n_p, cls), out_dtype),
        grid_spec=pltpu.PrefetchScalarGridSpec(
            num_scalar_prefetch=0,
            grid=(n_p // tm, n_p // tk),
            in_specs=[
                pl.BlockSpec((tm, tk), lambda i, k: (i, k)),
                b_spec,
                pl.BlockSpec((1, cls), lambda i, k: (0, 0)),
            ],
            out_specs=pl.BlockSpec((tm, cls), lambda i, k: (i, 0)),
            scratch_shapes=[pltpu.VMEM((tm, cls), jnp.float32)],
        ),
        compiler_params=pltpu.CompilerParams(
            dimension_semantics=("parallel", "arbitrary"),
            vmem_limit_bytes=_VMEM_LIMIT,
        ),
    )(a, hw3, b3)


# ---------------------------------------------------------------------------
# Fully fused single-kernel forward for small graphs (all-VMEM).
# ---------------------------------------------------------------------------
def _fused_small_kernel(a_ref, x_ref, w1_ref, b1_ref, w3_ref, b3_ref, o_ref):
    cdt = a_ref.dtype
    xw = jnp.dot(x_ref[...], w1_ref[...], preferred_element_type=jnp.float32)
    h = jnp.dot(a_ref[...], xw.astype(cdt), preferred_element_type=jnp.float32)
    h = jnp.maximum(h + b1_ref[...], 0.0)          # conv1 bias + ReLU; dropout(eval)=id
    hw3 = jnp.dot(h.astype(cdt), w3_ref[...], preferred_element_type=jnp.float32)
    out = jnp.dot(a_ref[...], hw3.astype(cdt), preferred_element_type=jnp.float32)
    o_ref[...] = (out + b3_ref[...]).astype(o_ref.dtype)


def fused_small_forward(a, x, w1, b1, w3, b3):
    n_p, cin = x.shape
    hid = w1.shape[1]
    cls = w3.shape[1]
    return pl.pallas_call(
        _fused_small_kernel,
        out_shape=jax.ShapeDtypeStruct((n_p, cls), jnp.float32),
        grid_spec=pltpu.PrefetchScalarGridSpec(
            num_scalar_prefetch=0,
            grid=(1,),
            in_specs=[
                pl.BlockSpec((n_p, n_p), lambda i: (0, 0)),
                pl.BlockSpec((n_p, cin), lambda i: (0, 0)),
                pl.BlockSpec((cin, hid), lambda i: (0, 0)),
                pl.BlockSpec((1, hid), lambda i: (0, 0)),
                pl.BlockSpec((hid, cls), lambda i: (0, 0)),
                pl.BlockSpec((1, cls), lambda i: (0, 0)),
            ],
            out_specs=pl.BlockSpec((n_p, cls), lambda i: (0, 0)),
        ),
        compiler_params=pltpu.CompilerParams(
            dimension_semantics=("arbitrary",),
            vmem_limit_bytes=_VMEM_LIMIT,
        ),
    )(a, x, w1, b1, w3, b3)


# ---------------------------------------------------------------------------
# Graph glue + forward
# ---------------------------------------------------------------------------
def build_normalized_adjacency(edge_index, num_nodes, padded_nodes,
                               dtype=jnp.bfloat16):
    """Dense GCN normalization D^-1/2 (A + I) D^-1/2 built DIRECTLY at the
    padded size and cast once (no second full-size pad/cast copy)."""
    src, dst = edge_index[0], edge_index[1]
    a = jnp.zeros((padded_nodes, padded_nodes), dtype=jnp.float32)
    a = a.at[src, dst].set(1.0)
    a = a.at[dst, src].set(1.0)                       # undirected
    valid = (jnp.arange(padded_nodes) < num_nodes).astype(jnp.float32)
    a = jnp.maximum(a, jnp.diag(valid))               # self-loops on real nodes only
    deg = jnp.sum(a, axis=1)
    d_inv_sqrt = jnp.where(deg > 0, jax.lax.rsqrt(jnp.maximum(deg, 1e-12)), 0.0)
    return (d_inv_sqrt[:, None] * a * d_inv_sqrt[None, :]).astype(dtype)


def gnn_forward(x, edge_index, w1, b1, w3, b3, *, force_tiled=False):
    """GNN.forward: conv1 -> ReLU -> dropout(eval) -> conv3 (conv2 unused)."""
    n, c_in = x.shape
    hidden = w1.shape[1]
    n_classes = w3.shape[1]

    cin_p = _round_up(c_in, LANE)
    hid_p = _round_up(hidden, LANE)
    cls_p = _round_up(n_classes, LANE)

    # Small graphs: everything fits in one VMEM tile -> single fused launch.
    n_p128 = _round_up(n, LANE)
    fused_bytes = (n_p128 * n_p128 * 2 + n_p128 * cin_p * 2
                   + 3 * n_p128 * hid_p * 4 + 2 * n_p128 * cls_p * 4)
    use_fused = (not force_tiled) and fused_bytes <= 6 * 1024 * 1024

    # Tiled path: pad N to a multiple of the row tile so large tiles survive
    # tile selection and the 'parallel' row axis splits evenly over 2 TCs.
    n_p = n_p128 if use_fused else _round_up(n, 512)

    a_p = build_normalized_adjacency(edge_index, n, n_p, dtype=jnp.bfloat16)
    x_p = _pad2d(x, n_p, cin_p).astype(jnp.bfloat16)
    w1_p = _pad2d(w1, cin_p, hid_p).astype(jnp.bfloat16)
    w3_p = _pad2d(w3, hid_p, cls_p).astype(jnp.bfloat16)
    b1_p = _pad2d(b1.reshape(1, -1).astype(jnp.float32), 1, hid_p)
    b3_p = _pad2d(b3.reshape(1, -1).astype(jnp.float32), 1, cls_p)

    if use_fused:
        out = fused_small_forward(a_p, x_p, w1_p, b1_p, w3_p, b3_p)
    else:
        # conv1 feature transform hoisted out of the A_hat stream.
        xw = thin_matmul(x_p, w1_p, out_dtype=jnp.bfloat16)
        # pass 1: HW3 = relu(A_hat @ XW + b1) @ W3 (W3 fused into the epilogue).
        hw3 = a_stream_pass1(a_p, xw, b1_p, w3_p, out_dtype=jnp.bfloat16)
        # pass 2: OUT = A_hat @ HW3 + b3
        out = a_stream_pass2(a_p, hw3, b3_p, out_dtype=jnp.float32)
    return out[:n, :n_classes]


if __name__ == "__main__":
    def reference(x, edge_index, w1, b1, w3, b3):
        n = x.shape[0]
        a = build_normalized_adjacency(edge_index, n, n, dtype=jnp.float32)
        h = jnp.maximum(a @ (x @ w1) + b1[None, :], 0.0)
        return a @ (h @ w3) + b3[None, :]

    def make_problem(key, n, c_in, hid, cls, n_edges):
        k_x, k_e, k_w1, k_b1, k_w3, k_b3 = jax.random.split(key, 6)
        x = jax.random.normal(k_x, (n, c_in), jnp.float32)
        edge_index = jax.random.randint(k_e, (2, n_edges), 0, n, dtype=jnp.int32)
        lim1 = (6.0 / (c_in + hid)) ** 0.5
        w1 = jax.random.uniform(k_w1, (c_in, hid), jnp.float32, -lim1, lim1)
        b1 = 0.1 * jax.random.normal(k_b1, (hid,), jnp.float32)
        lim3 = (6.0 / (hid + cls)) ** 0.5
        w3 = jax.random.uniform(k_w3, (hid, cls), jnp.float32, -lim3, lim3)
        b3 = 0.1 * jax.random.normal(k_b3, (cls,), jnp.float32)
        return x, edge_index, w1, b1, w3, b3

    key = jax.random.PRNGKey(0)
    k1, k2 = jax.random.split(key)

    # 1) Small "Cora-like" demo -> single fused all-VMEM kernel.
    args1 = make_problem(k1, 64, 32, 32, 8, 128)
    out1 = jax.block_until_ready(jax.jit(gnn_forward)(*args1))
    ref1 = reference(*args1)
    err1 = float(jnp.max(jnp.abs(out1 - ref1)))
    tol1 = 5e-2 * max(1.0, float(jnp.max(jnp.abs(ref1))))
    assert out1.shape == ref1.shape and err1 <= tol1, (err1, tol1)

    # 2) Larger graph forced through the tiled A-streaming path (resident B,
    #    fused W3 epilogue, large tiles).
    args2 = make_problem(k2, 600, 96, 64, 7, 3000)
    fwd_tiled = jax.jit(functools.partial(gnn_forward, force_tiled=True))
    out2 = jax.block_until_ready(fwd_tiled(*args2))
    ref2 = reference(*args2)
    err2 = float(jnp.max(jnp.abs(out2 - ref2)))
    tol2 = 5e-2 * max(1.0, float(jnp.max(jnp.abs(ref2))))
    assert out2.shape == ref2.shape and err2 <= tol2, (err2, tol2)

    print("KERNEL_OK")
</pallas_src>

<mosaic_0001>
module attributes {stable_mosaic.version = 11 : i64} {
  func.func @_fused_small_kernel(%arg0: i32, %arg1: memref<128x128xbf16, #tpu.memory_space<vmem>>, %arg2: memref<128x128xbf16, #tpu.memory_space<vmem>>, %arg3: memref<128x128xbf16, #tpu.memory_space<vmem>>, %arg4: memref<1x128xf32, #tpu.memory_space<vmem>>, %arg5: memref<128x128xbf16, #tpu.memory_space<vmem>>, %arg6: memref<1x128xf32, #tpu.memory_space<vmem>>, %arg7: memref<128x128xf32, #tpu.memory_space<vmem>>) attributes {dimension_semantics = [#tpu.dimension_semantics<arbitrary>], iteration_bounds = array<i64: 1>, scalar_prefetch = 0 : i64, scratch_operands = 0 : i64, tpu.core_type = #tpu.core_type<tc>, window_params = [{pipeline_mode = #tpu.pipeline_mode<synchronous>, transform_indices = @transform_0, window_bounds = array<i64: 128, 128>}, {pipeline_mode = #tpu.pipeline_mode<synchronous>, transform_indices = @transform_1, window_bounds = array<i64: 128, 128>}, {pipeline_mode = #tpu.pipeline_mode<synchronous>, transform_indices = @transform_2, window_bounds = array<i64: 128, 128>}, {pipeline_mode = #tpu.pipeline_mode<synchronous>, transform_indices = @transform_3, window_bounds = array<i64: 1, 128>}, {pipeline_mode = #tpu.pipeline_mode<synchronous>, transform_indices = @transform_4, window_bounds = array<i64: 128, 128>}, {pipeline_mode = #tpu.pipeline_mode<synchronous>, transform_indices = @transform_5, window_bounds = array<i64: 1, 128>}, {pipeline_mode = #tpu.pipeline_mode<synchronous>, transform_indices = @transform_6, window_bounds = array<i64: 128, 128>}]} {
    %c0 = arith.constant 0 : index
    %c0_0 = arith.constant 0 : index
    %0 = vector.load %arg2[%c0, %c0_0] : memref<128x128xbf16, #tpu.memory_space<vmem>>, vector<128x128xbf16>
    %c0_1 = arith.constant 0 : index
    %c0_2 = arith.constant 0 : index
    %1 = vector.load %arg3[%c0_1, %c0_2] : memref<128x128xbf16, #tpu.memory_space<vmem>>, vector<128x128xbf16>
    %cst = arith.constant dense<0.000000e+00> : vector<128x128xf32>
    %2 = tpu.matmul %0, %1, %cst {dimension_numbers = #tpu.dot_dimension_numbers<[1], [0], [0], [1], [0, 0, 1, 1], [], []>} : vector<128x128xbf16>, vector<128x128xbf16>, vector<128x128xf32> -> vector<128x128xf32>
    %c0_3 = arith.constant 0 : index
    %c0_4 = arith.constant 0 : index
    %3 = vector.load %arg1[%c0_3, %c0_4] : memref<128x128xbf16, #tpu.memory_space<vmem>>, vector<128x128xbf16>
    %4 = arith.truncf %2 : vector<128x128xf32> to vector<128x128xbf16>
    %cst_5 = arith.constant dense<0.000000e+00> : vector<128x128xf32>
    %5 = tpu.matmul %3, %4, %cst_5 {dimension_numbers = #tpu.dot_dimension_numbers<[1], [0], [0], [1], [0, 0, 1, 1], [], []>} : vector<128x128xbf16>, vector<128x128xbf16>, vector<128x128xf32> -> vector<128x128xf32>
    %c0_6 = arith.constant 0 : index
    %c0_7 = arith.constant 0 : index
    %6 = vector.load %arg4[%c0_6, %c0_7] : memref<1x128xf32, #tpu.memory_space<vmem>>, vector<1x128xf32>
    %7 = vector.broadcast %6 : vector<1x128xf32> to vector<128x128xf32>
    %8 = arith.addf %5, %7 : vector<128x128xf32>
    %cst_8 = arith.constant 0.000000e+00 : f32
    %9 = vector.broadcast %cst_8 : f32 to vector<128x128xf32>
    %10 = arith.maximumf %8, %9 : vector<128x128xf32>
    %11 = arith.truncf %10 : vector<128x128xf32> to vector<128x128xbf16>
    %c0_9 = arith.constant 0 : index
    %c0_10 = arith.constant 0 : index
    %12 = vector.load %arg5[%c0_9, %c0_10] : memref<128x128xbf16, #tpu.memory_space<vmem>>, vector<128x128xbf16>
    %cst_11 = arith.constant dense<0.000000e+00> : vector<128x128xf32>
    %13 = tpu.matmul %11, %12, %cst_11 {dimension_numbers = #tpu.dot_dimension_numbers<[1], [0], [0], [1], [0, 0, 1, 1], [], []>} : vector<128x128xbf16>, vector<128x128xbf16>, vector<128x128xf32> -> vector<128x128xf32>
    %c0_12 = arith.constant 0 : index
    %c0_13 = arith.constant 0 : index
    %14 = vector.load %arg1[%c0_12, %c0_13] : memref<128x128xbf16, #tpu.memory_space<vmem>>, vector<128x128xbf16>
    %15 = arith.truncf %13 : vector<128x128xf32> to vector<128x128xbf16>
    %cst_14 = arith.constant dense<0.000000e+00> : vector<128x128xf32>
    %16 = tpu.matmul %14, %15, %cst_14 {dimension_numbers = #tpu.dot_dimension_numbers<[1], [0], [0], [1], [0, 0, 1, 1], [], []>} : vector<128x128xbf16>, vector<128x128xbf16>, vector<128x128xf32> -> vector<128x128xf32>
    %c0_15 = arith.constant 0 : index
    %c0_16 = arith.constant 0 : index
    %17 = vector.load %arg6[%c0_15, %c0_16] : memref<1x128xf32, #tpu.memory_space<vmem>>, vector<1x128xf32>
    %18 = vector.broadcast %17 : vector<1x128xf32> to vector<128x128xf32>
    %19 = arith.addf %16, %18 : vector<128x128xf32>
    %c0_17 = arith.constant 0 : index
    %c0_18 = arith.constant 0 : index
    %20 = vector.load %arg7[%c0_17, %c0_18] : memref<128x128xf32, #tpu.memory_space<vmem>>, vector<128x128xf32>
    tpu.vector_store %arg7[%c0_17, %c0_18], %19 {strides = array<i32>} : memref<128x128xf32, #tpu.memory_space<vmem>>, vector<128x128xf32>,
    return
  }
  func.func @transform_0(%arg0: i32) -> (i32, i32) {
    %c0_i32 = arith.constant 0 : i32
    %c0_i32_0 = arith.constant 0 : i32
    %c0_i32_1 = arith.constant 0 : i32
    return %c0_i32, %c0_i32_0 : i32, i32
  }
  func.func @transform_1(%arg0: i32) -> (i32, i32) {
    %c0_i32 = arith.constant 0 : i32
    %c0_i32_0 = arith.constant 0 : i32
    %c0_i32_1 = arith.constant 0 : i32
    return %c0_i32, %c0_i32_0 : i32, i32
  }
  func.func @transform_2(%arg0: i32) -> (i32, i32) {
    %c0_i32 = arith.constant 0 : i32
    %c0_i32_0 = arith.constant 0 : i32
    %c0_i32_1 = arith.constant 0 : i32
    return %c0_i32, %c0_i32_0 : i32, i32
  }
  func.func @transform_3(%arg0: i32) -> (i32, i32) {
    %c0_i32 = arith.constant 0 : i32
    %c0_i32_0 = arith.constant 0 : i32
    %c0_i32_1 = arith.constant 0 : i32
    return %c0_i32, %c0_i32_0 : i32, i32
  }
  func.func @transform_4(%arg0: i32) -> (i32, i32) {
    %c0_i32 = arith.constant 0 : i32
    %c0_i32_0 = arith.constant 0 : i32
    %c0_i32_1 = arith.constant 0 : i32
    return %c0_i32, %c0_i32_0 : i32, i32
  }
  func.func @transform_5(%arg0: i32) -> (i32, i32) {
    %c0_i32 = arith.constant 0 : i32
    %c0_i32_0 = arith.constant 0 : i32
    %c0_i32_1 = arith.constant 0 : i32
    return %c0_i32, %c0_i32_0 : i32, i32
  }
  func.func @transform_6(%arg0: i32) -> (i32, i32) {
    %c0_i32 = arith.constant 0 : i32
    %c0_i32_0 = arith.constant 0 : i32
    %c0_i32_1 = arith.constant 0 : i32
    return %c0_i32, %c0_i32_0 : i32, i32
  }
}

</mosaic_0001>

<bundles_post_ra>
// kernel: gnn_forward.1
= control target key start
LH: loop header
LB: loop body
LE: loop exit
PB: predicated region body
PF: predicated region fallthrough
CT: control target
= control target key end

     0   :  { %s1217_s2 = inlined_call_operand.vmem [shape: bf16[128,128], index: 2, kind: input, shape index: {}]   ;;  %s1218_s1 = inlined_call_operand.vmem [shape: bf16[128,128], index: 1, kind: input, shape index: {}]   ;;  %s1219_s0 = inlined_call_operand.vmem [shape: bf16[128,128], index: 0, kind: input, shape index: {}]   ;;  %s1220_s4 = inlined_call_operand.vmem [shape: bf16[128,128], index: 4, kind: input, shape index: {}]   ;;  %s1221_s3 = inlined_call_operand.vmem [shape: f32[1,128], index: 3, kind: input, shape index: {}]   ;;  %s1222_s5 = inlined_call_operand.vmem [shape: f32[1,128], index: 5, kind: input, shape index: {}]   ;;  %s1223_s6 = inlined_call_operand.vmem [shape: f32[128,128], index: 6, kind: output, shape index: {}]  }
   0x1   :  { %v968_v0 = vld [vmem:[%s1217_s2] sm:$0xff]   ;;  %v969_v1 = vld [vmem:[%s1217_s2 + $0x8] sm:$0xff]   ;;  %v970_v2 = vld [vmem:[%s1217_s2 + $0x10] sm:$0xff]  }
   0x2   :  { %840 = vmatprep.subr.bf16.mxu0 %v968_v0  ;;  %v971_v3 = vld [vmem:[%s1217_s2 + $0x18] sm:$0xff]   ;;  %v976_v4 = vld [vmem:[%s1218_s1] sm:$0xff]   ;;  %v973_v6 = vld [vmem:[%s1217_s2 + $0x28] sm:$0xff]  }
   0x3   :  { %841 = vmatpush3.bf16.msra.mxu0 %v968_v0  ;;  %856 = vmatprep.mubr.bf16.mxu0 %v976_v4  ;;  %v972_v5 = vld [vmem:[%s1217_s2 + $0x20] sm:$0xff]   ;;  %v974_v7 = vld [vmem:[%s1217_s2 + $0x30] sm:$0xff]   ;;  %v975_v8 = vld [vmem:[%s1217_s2 + $0x38] sm:$0xff]  }
   0x4   :  { %842 = vmatprep.subr.bf16.mxu0 %v969_v1  ;;  %v977_v9 = vld [vmem:[%s1218_s1 + $0x8] sm:$0xff]   ;;  %v978_v10 = vld [vmem:[%s1218_s1 + $0x10] sm:$0xff]   ;;  %v979_v11 = vld [vmem:[%s1218_s1 + $0x18] sm:$0xff]  }
   0x5   :  { %v980_v12 = vld [vmem:[%s1218_s1 + $0x20] sm:$0xff]   ;;  %v981_v13 = vld [vmem:[%s1218_s1 + $0x28] sm:$0xff]   ;;  %v982_v14 = vld [vmem:[%s1218_s1 + $0x30] sm:$0xff]  }
   0x6   :  { %v983_v15 = vld [vmem:[%s1218_s1 + $0x38] sm:$0xff]   ;;  %v1086_v16 = vld [vmem:[%s1219_s0] sm:$0xff]   ;;  %v993_v18 = vld [vmem:[%s1220_s4 + $0x8] sm:$0xff]  }
   0x7   :  { %843 = vmatpush3.bf16.msra.mxu0 %v969_v1  ;;  %888 = vmatprep.mubr.bf16.mxu1 %v1086_v16  ;;  %v992_v17 = vld [vmem:[%s1220_s4] sm:$0xff]   ;;  %v994_v19 = vld [vmem:[%s1220_s4 + $0x10] sm:$0xff]   ;;  %v995_v20 = vld [vmem:[%s1220_s4 + $0x18] sm:$0xff]  }
   0x8   :  { %844 = vmatprep.subr.bf16.mxu0 %v970_v2  ;;  %v996_v21 = vld [vmem:[%s1220_s4 + $0x20] sm:$0xff]   ;;  %v997_v22 = vld [vmem:[%s1220_s4 + $0x28] sm:$0xff]   ;;  %v1115_v48 = vld [vmem:[%s1219_s0 + $0x10] sm:$0xff]  }
   0x9   :  { %v1110_v47 = vld [vmem:[%s1219_s0 + $0x8] sm:$0xff]   ;;  %v1122_v49 = vld [vmem:[%s1219_s0 + $0x18] sm:$0xff]   ;;  %v1127_v50 = vld [vmem:[%s1219_s0 + $0x20] sm:$0xff]  }
   0xa   :  { %v1134_v51 = vld [vmem:[%s1219_s0 + $0x28] sm:$0xff]   ;;  %v1139_v52 = vld [vmem:[%s1219_s0 + $0x30] sm:$0xff]   ;;  %v1146_v53 = vld [vmem:[%s1219_s0 + $0x38] sm:$0xff]  }
   0xb   :  { %845 = vmatpush3.bf16.msra.mxu0 %v970_v2  ;;  %v998_v54 = vld [vmem:[%s1220_s4 + $0x30] sm:$0xff]   ;;  %v999_v55 = vld [vmem:[%s1220_s4 + $0x38] sm:$0xff]   ;;  %v758_v56 = vld [vmem:[%s1221_s3] ss:$0 sm:$0xff] }
   0xc   :  { %846 = vmatprep.subr.bf16.mxu0 %v971_v3 }
   0xf   :  { %847 = vmatpush3.bf16.msra.mxu0 %v971_v3 }
  0x10   :  { %848 = vmatprep.subr.bf16.mxu0 %v972_v5 }
  0x13   :  { %849 = vmatpush3.bf16.msra.mxu0 %v972_v5 }
  0x14   :  { %850 = vmatprep.subr.bf16.mxu0 %v973_v6 }
  0x17   :  { %851 = vmatpush3.bf16.msra.mxu0 %v973_v6 }
  0x18   :  { %852 = vmatprep.subr.bf16.mxu0 %v974_v7 }
  0x1b   :  { %853 = vmatpush3.bf16.msra.mxu0 %v974_v7 }
  0x1c   :  { %854 = vmatprep.subr.bf16.mxu0 %v975_v8 }
  0x1f   :  { %855 = vmatpush3.bf16.msra.mxu0 %v975_v8 }
  0x20   :  { %904 = vmatprep.subr.bf16.mxu0 %v992_v17 }
  0x22   :  { %857 = vmatmul.mubr.bf16.vlgmr.msra.gmra.mrb[0].mxu0 %v977_v9 }
  0x23   :  { %860 = vmatprep.mubr.bf16.mxu0 %v978_v10  ;;  %905 = vmatpush3.bf16.msra.mxu0 %v992_v17 }
  0x24   :  { %906 = vmatprep.subr.bf16.mxu0 %v993_v18 }
  0x27   :  { %907 = vmatpush3.bf16.msra.mxu0 %v993_v18 }
  0x28   :  { %908 = vmatprep.subr.bf16.mxu0 %v994_v19 }
  0x2a   :  { %861 = vmatmul.mubr.bf16.gmra.mrb[4].mxu0 %v979_v11 }
  0x2b   :  { %864 = vmatprep.mubr.bf16.mxu0 %v980_v12  ;;  %909 = vmatpush3.bf16.msra.mxu0 %v994_v19 }
  0x2c   :  { %910 = vmatprep.subr.bf16.mxu0 %v995_v20 }
  0x2f   :  { %911 = vmatpush3.bf16.msra.mxu0 %v995_v20 }
  0x30   :  { %912 = vmatprep.subr.bf16.mxu0 %v996_v21 }
  0x32   :  { %865 = vmatmul.mubr.bf16.gmra.mrb[8].mxu0 %v981_v13 }
  0x33   :  { %868 = vmatprep.mubr.bf16.mxu0 %v982_v14  ;;  %913 = vmatpush3.bf16.msra.mxu0 %v996_v21 }
  0x34   :  { %914 = vmatprep.subr.bf16.mxu0 %v997_v22 }
  0x37   :  { %915 = vmatpush3.bf16.msra.mxu0 %v997_v22 }
  0x38   :  { %916 = vmatprep.subr.bf16.mxu0 %v998_v54 }
  0x3a   :  { %869 = vmatmul.mubr.bf16.gmra.mrb[12].mxu0 %v983_v15 }
  0x3b   :  { %917 = vmatpush3.bf16.msra.mxu0 %v998_v54 }
  0x3c   :  { %918 = vmatprep.subr.bf16.mxu0 %v999_v55 }
  0x3f   :  { %919 = vmatpush3.bf16.msra.mxu0 %v999_v55 }
  0xf5   :  { %v858_v23 = vpop.f32.mrb[0].mxu0 }
  0xf6   :  { %v186_v24 = vpop.f32.mrb[1].mxu0 }
  0xf7   :  { %v859_v25 = vpop.f32.mrb[2].mxu0 }
  0xf8   :  { %v266_v26 = vpack.c.bf16 %v859_v25, %v858_v23  ;;  %v189_v27 = vpop.f32.mrb[3].mxu0 }
  0xf9   :  { %v265_v28 = vpack.c.bf16 %v189_v27, %v186_v24 }
  0xfb   :  { %872 = vmatprep.subr.bf16.mxu1 %v265_v28 }
  0xfc   :  { %873 = vmatpush3.bf16.msra.mxu1 %v265_v28 }
  0xfd   :  { %v862_v29 = vpop.f32.mrb[4].mxu0  ;;  %874 = vmatprep.subr.bf16.mxu1 %v266_v26 }
  0xfe   :  { %v202_v30 = vpop.f32.mrb[5].mxu0 }
  0xff   :  { %v863_v31 = vpop.f32.mrb[6].mxu0 }
 0x100   :  { %v268_v32 = vpack.c.bf16 %v863_v31, %v862_v29  ;;  %v205_v33 = vpop.f32.mrb[7].mxu0  ;;  %875 = vmatpush3.bf16.msra.mxu1 %v266_v26 }
 0x101   :  { %v267_v34 = vpack.c.bf16 %v205_v33, %v202_v30 }
 0x103   :  { %876 = vmatprep.subr.bf16.mxu1 %v267_v34 }
 0x104   :  { %877 = vmatpush3.bf16.msra.mxu1 %v267_v34 }
 0x105   :  { %v866_v35 = vpop.f32.mrb[8].mxu0  ;;  %878 = vmatprep.subr.bf16.mxu1 %v268_v32 }
 0x106   :  { %v218_v36 = vpop.f32.mrb[9].mxu0 }
 0x107   :  { %v867_v37 = vpop.f32.mrb[10].mxu0 }
 0x108   :  { %v270_v38 = vpack.c.bf16 %v867_v37, %v866_v35  ;;  %v221_v39 = vpop.f32.mrb[11].mxu0  ;;  %879 = vmatpush3.bf16.msra.mxu1 %v268_v32 }
 0x109   :  { %v269_v40 = vpack.c.bf16 %v221_v39, %v218_v36 }
 0x10b   :  { %880 = vmatprep.subr.bf16.mxu1 %v269_v40 }
 0x10c   :  { %881 = vmatpush3.bf16.msra.mxu1 %v269_v40 }
 0x10d   :  { %v870_v41 = vpop.f32.mrb[12].mxu0  ;;  %882 = vmatprep.subr.bf16.mxu1 %v270_v38 }
 0x10e   :  { %v234_v42 = vpop.f32.mrb[13].mxu0 }
 0x10f   :  { %v871_v43 = vpop.f32.mrb[14].mxu0 }
 0x110   :  { %v272_v44 = vpack.c.bf16 %v871_v43, %v870_v41  ;;  %v237_v45 = vpop.f32.mrb[15].mxu0  ;;  %883 = vmatpush3.bf16.msra.mxu1 %v270_v38 }
 0x111   :  { %v271_v46 = vpack.c.bf16 %v237_v45, %v234_v42 }
 0x113   :  { %884 = vmatprep.subr.bf16.mxu1 %v271_v46 }
 0x114   :  { %885 = vmatpush3.bf16.msra.mxu1 %v271_v46 }
 0x115   :  { %886 = vmatprep.subr.bf16.mxu1 %v272_v44 }
 0x118   :  { %887 = vmatpush3.bf16.msra.mxu1 %v272_v44 }
 0x11b   :  { %889 = vmatmul.mubr.bf16.vlgmr.msra.gmra.mrb[0].mxu1 %v1110_v47 }
 0x11c   :  { %892 = vmatprep.mubr.bf16.mxu1 %v1115_v48 }
 0x123   :  { %893 = vmatmul.mubr.bf16.gmra.mrb[4].mxu1 %v1122_v49 }
 0x124   :  { %896 = vmatprep.mubr.bf16.mxu1 %v1127_v50 }
 0x12b   :  { %897 = vmatmul.mubr.bf16.gmra.mrb[8].mxu1 %v1134_v51 }
 0x12c   :  { %900 = vmatprep.mubr.bf16.mxu1 %v1139_v52 }
 0x133   :  { %901 = vmatmul.mubr.bf16.gmra.mrb[12].mxu1 %v1146_v53 }
 0x134   :  { %952 = vmatprep.mubr.bf16.mxu1 %v1086_v16 }
 0x1ee   :  { %v890_v57 = vpop.f32.mrb[0].mxu1 }
 0x1ef   :  { %v371_v58 = vadd.f32 %v890_v57, %v758_v56  ;;  %v362_v59 = vpop.f32.mrb[1].mxu1 }
 0x1f0   :  { %v363_v60 = vadd.f32 %v758_v56, %v362_v59  ;;  %v891_v61 = vpop.f32.mrb[2].mxu1 }
 0x1f1   :  { %v374_v62 = vadd.f32 %v891_v61, %v758_v56  ;;  %v365_v63 = vpop.f32.mrb[3].mxu1  ;;  %v427_v1 = vmax.f32 %v371_v58, 0.0 }
 0x1f2   :  { %v366_v0 = vadd.f32 %v758_v56, %v365_v63  ;;  %v425_v3 = vmax.f32 %v363_v60, 0.0 }
 0x1f3   :  { %v428_v2 = vmax.f32 %v374_v62, 0.0 }
 0x1f4   :  { %v426_v4 = vmax.f32 %v366_v0, 0.0 }
 0x1f5   :  { %v442_v5 = vpack.c.bf16 %v428_v2, %v427_v1 }
 0x1f6   :  { %v441_v6 = vpack.c.bf16 %v426_v4, %v425_v3  ;;  %v894_v7 = vpop.f32.mrb[4].mxu1 }
 0x1f7   :  { %v387_v8 = vadd.f32 %v894_v7, %v758_v56  ;;  %v378_v9 = vpop.f32.mrb[5].mxu1 }
 0x1f8   :  { %v379_v10 = vadd.f32 %v758_v56, %v378_v9  ;;  %v895_v11 = vpop.f32.mrb[6].mxu1  ;;  %920 = vmatprep.mubr.bf16.mxu0 %v441_v6 }
 0x1f9   :  { %v390_v12 = vadd.f32 %v895_v11, %v758_v56  ;;  %v381_v13 = vpop.f32.mrb[7].mxu1  ;;  %921 = vmatmul.mubr.bf16.vlgmr.msra.gmra.mrb[16].mxu0 %v442_v5  ;;  %v431_v15 = vmax.f32 %v387_v8, 0.0 }
 0x1fa   :  { %v382_v14 = vadd.f32 %v758_v56, %v381_v13  ;;  %v429_v17 = vmax.f32 %v379_v10, 0.0 }
 0x1fb   :  { %v432_v16 = vmax.f32 %v390_v12, 0.0 }
 0x1fc   :  { %v430_v18 = vmax.f32 %v382_v14, 0.0 }
 0x1fd   :  { %v444_v19 = vpack.c.bf16 %v432_v16, %v431_v15  ;;  %v775_v16 = vld [vmem:[%s1222_s5] ss:$0 sm:$0xff] }
 0x1fe   :  { %v443_v20 = vpack.c.bf16 %v430_v18, %v429_v17  ;;  %v898_v21 = vpop.f32.mrb[8].mxu1 }
 0x1ff   :  { %v403_v22 = vadd.f32 %v898_v21, %v758_v56  ;;  %v394_v23 = vpop.f32.mrb[9].mxu1 }
 0x200   :  { %v395_v24 = vadd.f32 %v758_v56, %v394_v23  ;;  %v899_v25 = vpop.f32.mrb[10].mxu1  ;;  %924 = vmatprep.mubr.bf16.mxu0 %v443_v20 }
 0x201   :  { %v406_v26 = vadd.f32 %v899_v25, %v758_v56  ;;  %v397_v27 = vpop.f32.mrb[11].mxu1  ;;  %925 = vmatmul.mubr.bf16.gmra.mrb[20].mxu0 %v444_v19  ;;  %v435_v29 = vmax.f32 %v403_v22, 0.0 }
 0x202   :  { %v398_v28 = vadd.f32 %v758_v56, %v397_v27  ;;  %v433_v31 = vmax.f32 %v395_v24, 0.0 }
 0x203   :  { %v436_v30 = vmax.f32 %v406_v26, 0.0 }
 0x204   :  { %v434_v32 = vmax.f32 %v398_v28, 0.0 }
 0x205   :  { %v446_v33 = vpack.c.bf16 %v436_v30, %v435_v29 }
 0x206   :  { %v445_v34 = vpack.c.bf16 %v434_v32, %v433_v31  ;;  %v902_v35 = vpop.f32.mrb[12].mxu1 }
 0x207   :  { %v419_v36 = vadd.f32 %v902_v35, %v758_v56  ;;  %v410_v37 = vpop.f32.mrb[13].mxu1 }
 0x208   :  { %v411_v38 = vadd.f32 %v758_v56, %v410_v37  ;;  %v903_v39 = vpop.f32.mrb[14].mxu1  ;;  %928 = vmatprep.mubr.bf16.mxu0 %v445_v34 }
 0x209   :  { %v422_v40 = vadd.f32 %v903_v39, %v758_v56  ;;  %v413_v41 = vpop.f32.mrb[15].mxu1  ;;  %929 = vmatmul.mubr.bf16.gmra.mrb[24].mxu0 %v446_v33  ;;  %v439_v43 = vmax.f32 %v419_v36, 0.0 }
 0x20a   :  { %v414_v42 = vadd.f32 %v758_v56, %v413_v41  ;;  %v437_v45 = vmax.f32 %v411_v38, 0.0 }
 0x20b   :  { %v440_v44 = vmax.f32 %v422_v40, 0.0 }
 0x20c   :  { %v438_v46 = vmax.f32 %v414_v42, 0.0 }
 0x20d   :  { %v448_v54 = vpack.c.bf16 %v440_v44, %v439_v43 }
 0x20e   :  { %v447_v55 = vpack.c.bf16 %v438_v46, %v437_v45 }
 0x210   :  { %932 = vmatprep.mubr.bf16.mxu0 %v447_v55 }
 0x211   :  { %933 = vmatmul.mubr.bf16.gmra.mrb[28].mxu0 %v448_v54 }
 0x2cc   :  { %v922_v57 = vpop.f32.mrb[16].mxu0 }
 0x2cd   :  { %v547_v58 = vpop.f32.mrb[17].mxu0 }
 0x2ce   :  { %v923_v59 = vpop.f32.mrb[18].mxu0 }
 0x2cf   :  { %v611_v60 = vpack.c.bf16 %v923_v59, %v922_v57  ;;  %v550_v61 = vpop.f32.mrb[19].mxu0 }
 0x2d0   :  { %v610_v62 = vpack.c.bf16 %v550_v61, %v547_v58 }
 0x2d2   :  { %936 = vmatprep.subr.bf16.mxu1 %v610_v62 }
 0x2d3   :  { %937 = vmatpush3.bf16.msra.mxu1 %v610_v62 }
 0x2d4   :  { %v926_v63 = vpop.f32.mrb[20].mxu0  ;;  %938 = vmatprep.subr.bf16.mxu1 %v611_v60 }
 0x2d5   :  { %v563_v0 = vpop.f32.mrb[21].mxu0 }
 0x2d6   :  { %v927_v56 = vpop.f32.mrb[22].mxu0 }
 0x2d7   :  { %v613_v1 = vpack.c.bf16 %v927_v56, %v926_v63  ;;  %v566_v2 = vpop.f32.mrb[23].mxu0  ;;  %939 = vmatpush3.bf16.msra.mxu1 %v611_v60 }
 0x2d8   :  { %v612_v3 = vpack.c.bf16 %v566_v2, %v563_v0 }
 0x2da   :  { %940 = vmatprep.subr.bf16.mxu1 %v612_v3 }
 0x2db   :  { %941 = vmatpush3.bf16.msra.mxu1 %v612_v3 }
 0x2dc   :  { %v930_v4 = vpop.f32.mrb[24].mxu0  ;;  %942 = vmatprep.subr.bf16.mxu1 %v613_v1 }
 0x2dd   :  { %v579_v5 = vpop.f32.mrb[25].mxu0 }
 0x2de   :  { %v931_v6 = vpop.f32.mrb[26].mxu0 }
 0x2df   :  { %v615_v7 = vpack.c.bf16 %v931_v6, %v930_v4  ;;  %v582_v8 = vpop.f32.mrb[27].mxu0  ;;  %943 = vmatpush3.bf16.msra.mxu1 %v613_v1 }
 0x2e0   :  { %v614_v9 = vpack.c.bf16 %v582_v8, %v579_v5 }
 0x2e2   :  { %944 = vmatprep.subr.bf16.mxu1 %v614_v9 }
 0x2e3   :  { %945 = vmatpush3.bf16.msra.mxu1 %v614_v9 }
 0x2e4   :  { %v934_v10 = vpop.f32.mrb[28].mxu0  ;;  %946 = vmatprep.subr.bf16.mxu1 %v615_v7 }
 0x2e5   :  { %v595_v11 = vpop.f32.mrb[29].mxu0 }
 0x2e6   :  { %v935_v12 = vpop.f32.mrb[30].mxu0 }
 0x2e7   :  { %v617_v13 = vpack.c.bf16 %v935_v12, %v934_v10  ;;  %v598_v14 = vpop.f32.mrb[31].mxu0  ;;  %947 = vmatpush3.bf16.msra.mxu1 %v615_v7 }
 0x2e8   :  { %v616_v15 = vpack.c.bf16 %v598_v14, %v595_v11 }
 0x2ea   :  { %948 = vmatprep.subr.bf16.mxu1 %v616_v15 }
 0x2eb   :  { %949 = vmatpush3.bf16.msra.mxu1 %v616_v15 }
 0x2ec   :  { %950 = vmatprep.subr.bf16.mxu1 %v617_v13 }
 0x2ef   :  { %951 = vmatpush3.bf16.msra.mxu1 %v617_v13 }
 0x2f2   :  { %953 = vmatmul.mubr.bf16.vlgmr.msra.gmra.mrb[16].mxu1 %v1110_v47 }
 0x2f3   :  { %956 = vmatprep.mubr.bf16.mxu1 %v1115_v48 }
 0x2fa   :  { %957 = vmatmul.mubr.bf16.gmra.mrb[20].mxu1 %v1122_v49 }
 0x2fb   :  { %960 = vmatprep.mubr.bf16.mxu1 %v1127_v50 }
 0x302   :  { %961 = vmatmul.mubr.bf16.gmra.mrb[24].mxu1 %v1134_v51 }
 0x303   :  { %964 = vmatprep.mubr.bf16.mxu1 %v1139_v52 }
 0x30a   :  { %965 = vmatmul.mubr.bf16.gmra.mrb[28].mxu1 %v1146_v53 }
 0x3c5   :  { %v954_v17 = vpop.f32.mrb[16].mxu1 }
 0x3c6   :  { %v668_v18 = vadd.f32 %v954_v17, %v775_v16  ;;  %v659_v19 = vpop.f32.mrb[17].mxu1 }
 0x3c7   :  { %v660_v47 = vadd.f32 %v775_v16, %v659_v19  ;;  %v955_v20 = vpop.f32.mrb[18].mxu1 }
 0x3c8   :  { %724 = vst [vmem:[%s1223_s6 + $0x10] sm:$0xff] %v668_v18  ;;  %v671_v48 = vadd.f32 %v955_v20, %v775_v16  ;;  %v662_v49 = vpop.f32.mrb[19].mxu1 }
 0x3c9   :  { %722 = vst [vmem:[%s1223_s6] sm:$0xff] %v660_v47  ;;  %v663_v50 = vadd.f32 %v775_v16, %v662_v49 }
 0x3ca   :  { %725 = vst [vmem:[%s1223_s6 + $0x18] sm:$0xff] %v671_v48 }
 0x3cb   :  { %723 = vst [vmem:[%s1223_s6 + $0x8] sm:$0xff] %v663_v50 }
 0x3cd   :  { %v958_v51 = vpop.f32.mrb[20].mxu1 }
 0x3ce   :  { %v684_v52 = vadd.f32 %v958_v51, %v775_v16  ;;  %v675_v53 = vpop.f32.mrb[21].mxu1 }
 0x3cf   :  { %v676_v21 = vadd.f32 %v775_v16, %v675_v53  ;;  %v959_v22 = vpop.f32.mrb[22].mxu1 }
 0x3d0   :  { %728 = vst [vmem:[%s1223_s6 + $0x30] sm:$0xff] %v684_v52  ;;  %v687_v23 = vadd.f32 %v959_v22, %v775_v16  ;;  %v678_v24 = vpop.f32.mrb[23].mxu1 }
 0x3d1   :  { %726 = vst [vmem:[%s1223_s6 + $0x20] sm:$0xff] %v676_v21  ;;  %v679_v25 = vadd.f32 %v775_v16, %v678_v24 }
 0x3d2   :  { %729 = vst [vmem:[%s1223_s6 + $0x38] sm:$0xff] %v687_v23 }
 0x3d3   :  { %727 = vst [vmem:[%s1223_s6 + $0x28] sm:$0xff] %v679_v25 }
 0x3d5   :  { %v962_v26 = vpop.f32.mrb[24].mxu1 }
 0x3d6   :  { %v700_v27 = vadd.f32 %v962_v26, %v775_v16  ;;  %v691_v28 = vpop.f32.mrb[25].mxu1 }
 0x3d7   :  { %v692_v29 = vadd.f32 %v775_v16, %v691_v28  ;;  %v963_v30 = vpop.f32.mrb[26].mxu1 }
 0x3d8   :  { %732 = vst [vmem:[%s1223_s6 + $0x50] sm:$0xff] %v700_v27  ;;  %v703_v31 = vadd.f32 %v963_v30, %v775_v16  ;;  %v694_v32 = vpop.f32.mrb[27].mxu1 }
 0x3d9   :  { %730 = vst [vmem:[%s1223_s6 + $0x40] sm:$0xff] %v692_v29  ;;  %v695_v33 = vadd.f32 %v775_v16, %v694_v32 }
 0x3da   :  { %733 = vst [vmem:[%s1223_s6 + $0x58] sm:$0xff] %v703_v31 }
 0x3db   :  { %731 = vst [vmem:[%s1223_s6 + $0x48] sm:$0xff] %v695_v33 }
 0x3dd   :  { %v966_v34 = vpop.f32.mrb[28].mxu1 }
 0x3de   :  { %v716_v35 = vadd.f32 %v966_v34, %v775_v16  ;;  %v707_v36 = vpop.f32.mrb[29].mxu1 }
 0x3df   :  { %v708_v37 = vadd.f32 %v775_v16, %v707_v36  ;;  %v967_v38 = vpop.f32.mrb[30].mxu1 }
 0x3e0   :  { %736 = vst [vmem:[%s1223_s6 + $0x70] sm:$0xff] %v716_v35  ;;  %v719_v39 = vadd.f32 %v967_v38, %v775_v16  ;;  %v710_v40 = vpop.f32.mrb[31].mxu1 }
 0x3e1   :  { %734 = vst [vmem:[%s1223_s6 + $0x60] sm:$0xff] %v708_v37  ;;  %v711_v41 = vadd.f32 %v775_v16, %v710_v40 }
 0x3e2   :  { %737 = vst [vmem:[%s1223_s6 + $0x78] sm:$0xff] %v719_v39 }
 0x3e3   :  { %735 = vst [vmem:[%s1223_s6 + $0x68] sm:$0xff] %v711_v41 }

</bundles_post_ra>
